<compile_context>
chip_gen: v7x
topology: tpu7x:2x2x1
jax: 0.10.0
libtpu: 0.0.40
codegen_flags: <defaults>
</compile_context>

<pallas_src>
import functools

import jax
import jax.numpy as jnp
from jax.experimental import pallas as pl
from jax.experimental.pallas import tpu as pltpu

LANE = 128


def _round_up(v, m):
    return ((v + m - 1) // m) * m


def _make_kernel(num_layers, dout_pads, dfe_pad):
    """Build the fused kernel (layer loop unrolled at trace time)."""

    def kernel(*refs):
        # refs = [x, wcat_0, bcat_0, ..., wcat_{L-1}, bcat_{L-1}, fe_out]
        x_ref = refs[0]
        fe_ref = refs[1 + 2 * num_layers]            # f32 (B_tile, L*dfe_pad)
        deep = x_ref[...]                            # bf16 (B_tile, Din0_pad)
        for i in range(num_layers):
            w_ref = refs[1 + 2 * i]                  # bf16 (Din_i, width_i)
            b_ref = refs[2 + 2 * i]                  # f32  (1,     width_i)

            # One lane-dense MXU matmul covers both the main linear and the
            # Fe linear:  y = deep @ [W_i | Wfe_i]   (f32 accumulation).
            # For the last layer only the Fe linear is present.
            y = jnp.dot(deep, w_ref[...], preferred_element_type=jnp.float32)
            y = y + b_ref[...]

            last = (i + 1 == num_layers)
            dp = 0 if last else dout_pads[i]         # 128-aligned split point
            # Fe branch: no activation; 128-aligned static-slice store into
            # the packed lane-dense output slab.
            fe_ref[:, i * dfe_pad:(i + 1) * dfe_pad] = y[:, dp:]
            # Main branch: relu, stays on-chip as next layer's input.
            if not last:
                deep = jnp.maximum(y[:, :dp], 0.0).astype(jnp.bfloat16)
        # TODO(synk): use_bn=True (BatchNorm1d) and dropout_rate>0 paths are
        # not implemented; with module defaults they are identity here.

    return kernel


def init_params(key, inputs_dim, hidden_units, field_dim, user_head,
                init_std=1e-4):
    """Deterministic f32 parameter init mirroring the module __init__ shapes.

    Main linear weights ~ N(0, init_std) (as in the PyTorch init loop);
    biases and Fe-linear params get small deterministic uniform values.
    Weights are stored transposed: (in, out).
    """
    dims = [inputs_dim] + list(hidden_units)
    fe_out = field_dim * user_head
    params = []
    for i in range(len(dims) - 1):
        k1, k2, k3, k4, key = jax.random.split(key, 5)
        din, dout = dims[i], dims[i + 1]
        w = init_std * jax.random.normal(k1, (din, dout), dtype=jnp.float32)
        b = 0.01 * jax.random.uniform(k2, (1, dout), dtype=jnp.float32,
                                      minval=-1.0, maxval=1.0)
        wfe = 0.05 * jax.random.uniform(k3, (din, fe_out), dtype=jnp.float32,
                                        minval=-1.0, maxval=1.0)
        bfe = 0.01 * jax.random.uniform(k4, (1, fe_out), dtype=jnp.float32,
                                        minval=-1.0, maxval=1.0)
        params.append((w, b, wfe, bfe))
    return params


def prepare_params(params):
    """Host-side one-time re-layout for the fused kernel.

    * [W | Wfe] concatenated along the output dim, each piece zero-padded to a
      multiple of 128 lanes, cast to bf16.  The last layer stores only Wfe
      (its fc output is never used).
    * Layer-0 input rows padded to a 128-lane input width; layer i>0 input
      rows padded to the previous layer's padded fc width, so the padded
      activation columns contribute nothing.
    * Biases kept f32, padded to match.
    """
    prepared = []
    dout_pads = []
    num_layers = len(params)
    dfe = params[0][2].shape[1]
    dfe_pad = _round_up(dfe, LANE)
    din0 = params[0][0].shape[0]
    din0_pad = _round_up(din0, LANE)
    for idx, (w, b, wfe, bfe) in enumerate(params):
        din, dout = w.shape
        dout_pad = _round_up(dout, LANE)
        din_k = din0_pad if idx == 0 else dout_pads[idx - 1]
        wfe_p = jnp.zeros((din_k, dfe_pad), jnp.float32).at[:din, :dfe].set(wfe)
        bfe_p = jnp.zeros((1, dfe_pad), jnp.float32).at[:, :dfe].set(bfe)
        if idx + 1 == num_layers:
            # Last layer: only the Fe linear is needed.
            wcat = wfe_p.astype(jnp.bfloat16)
            bcat = bfe_p
        else:
            w_p = jnp.zeros((din_k, dout_pad), jnp.float32).at[:din, :dout].set(w)
            b_p = jnp.zeros((1, dout_pad), jnp.float32).at[:, :dout].set(b)
            wcat = jnp.concatenate([w_p, wfe_p], axis=1).astype(jnp.bfloat16)
            bcat = jnp.concatenate([b_p, bfe_p], axis=1)
        prepared.append((wcat, bcat))
        dout_pads.append(dout_pad)
    return prepared, tuple(dout_pads), dfe_pad, dfe, din0_pad


def user_fe_dnn_forward(x, prepared, *, dout_pads, dfe_pad, dfe, din0_pad,
                        b_tile=128):
    """Fused Pallas implementation of User_Fe_DNN.forward: returns user_fe_rep."""
    B, din0 = x.shape
    num_layers = len(prepared)

    # Batch tiling: one grid axis over batch tiles, marked "parallel" so both
    # TensorCores on v7x split the batch. Pad B to a tile multiple; pad the
    # feature dim to 128 lanes for lane-dense x loads.
    b_tile = min(b_tile, _round_up(B, 8))
    b_pad = _round_up(B, b_tile)
    x_p = jnp.zeros((b_pad, din0_pad), jnp.bfloat16).at[:B, :din0].set(
        x.astype(jnp.bfloat16))
    grid = (b_pad // b_tile,)

    in_specs = [pl.BlockSpec((b_tile, din0_pad), lambda i: (i, 0))]
    flat_inputs = [x_p]
    for wcat, bcat in prepared:
        # Weights/biases fully resident in VMEM; constant block index across
        # the batch grid means they are DMA'd once, not per tile.
        in_specs.append(pl.BlockSpec(wcat.shape, lambda i: (0, 0)))
        in_specs.append(pl.BlockSpec(bcat.shape, lambda i: (0, 0)))
        flat_inputs += [wcat, bcat]

    fe_width = num_layers * dfe_pad
    out_shape = jax.ShapeDtypeStruct((b_pad, fe_width), jnp.float32)
    out_specs = pl.BlockSpec((b_tile, fe_width), lambda i: (i, 0))

    out = pl.pallas_call(
        _make_kernel(num_layers, dout_pads, dfe_pad),
        out_shape=out_shape,
        grid=grid,
        in_specs=in_specs,
        out_specs=out_specs,
        compiler_params=pltpu.CompilerParams(
            dimension_semantics=("parallel",)),
    )(*flat_inputs)

    # Strip batch/lane padding and unpack per-layer reps (cheap XLA slices
    # outside the kernel).
    return [out[:B, i * dfe_pad:i * dfe_pad + dfe] for i in range(num_layers)]


def user_fe_dnn_reference(x, params):
    """Pure-JAX f32 reference for correctness checking."""
    deep = x
    reps = []
    hi = jax.lax.Precision.HIGHEST
    for (w, b, wfe, bfe) in params:
        reps.append(jnp.dot(deep, wfe, precision=hi) + bfe)
        deep = jnp.maximum(jnp.dot(deep, w, precision=hi) + b, 0.0)
    return reps


if __name__ == "__main__":
    # Small shapes consistent with the module:
    #   inputs_dim=32, hidden_units=(32, 16), field_dim=4, user_head=6
    batch = 256            # exercises a real (parallel) batch-tile grid of 2
    inputs_dim = 32
    hidden_units = (32, 16)
    field_dim = 4
    user_head = 6

    key = jax.random.PRNGKey(0)
    kx, kp = jax.random.split(key)
    x = jax.random.normal(kx, (batch, inputs_dim), dtype=jnp.float32)
    params = init_params(kp, inputs_dim, hidden_units, field_dim, user_head)

    prepared, dout_pads, dfe_pad, dfe, din0_pad = prepare_params(params)

    fwd = jax.jit(functools.partial(
        user_fe_dnn_forward, dout_pads=dout_pads, dfe_pad=dfe_pad, dfe=dfe,
        din0_pad=din0_pad))
    reps = fwd(x, prepared)
    reps = [jax.block_until_ready(r) for r in reps]

    # Correctness vs. pure-f32 reference (kernel uses bf16 operands + f32
    # accumulation, so use a correspondingly loose tolerance).
    refs = user_fe_dnn_reference(x, params)
    for r, ref in zip(reps, refs):
        assert r.shape == (batch, field_dim * user_head)
        err = float(jnp.max(jnp.abs(r - ref)))
        assert jnp.allclose(r, ref, rtol=3e-2, atol=3e-3), err

    print("KERNEL_OK")
</pallas_src>

<mosaic_0001>
module attributes {stable_mosaic.version = 11 : i64} {
  func.func @kernel(%arg0: i32, %arg1: memref<128x128xbf16, #tpu.memory_space<vmem>>, %arg2: memref<128x256xbf16, #tpu.memory_space<vmem>>, %arg3: memref<1x256xf32, #tpu.memory_space<vmem>>, %arg4: memref<128x128xbf16, #tpu.memory_space<vmem>>, %arg5: memref<1x128xf32, #tpu.memory_space<vmem>>, %arg6: memref<128x256xf32, #tpu.memory_space<vmem>>) attributes {dimension_semantics = [#tpu.dimension_semantics<parallel>], iteration_bounds = array<i64: 2>, scalar_prefetch = 0 : i64, scratch_operands = 0 : i64, tpu.core_type = #tpu.core_type<tc>, window_params = [{transform_indices = @transform_0, window_bounds = array<i64: 128, 128>}, {pipeline_mode = #tpu.pipeline_mode<synchronous>, transform_indices = @transform_1, window_bounds = array<i64: 128, 256>}, {pipeline_mode = #tpu.pipeline_mode<synchronous>, transform_indices = @transform_2, window_bounds = array<i64: 1, 256>}, {pipeline_mode = #tpu.pipeline_mode<synchronous>, transform_indices = @transform_3, window_bounds = array<i64: 128, 128>}, {pipeline_mode = #tpu.pipeline_mode<synchronous>, transform_indices = @transform_4, window_bounds = array<i64: 1, 128>}, {transform_indices = @transform_5, window_bounds = array<i64: 128, 256>}]} {
    %c0 = arith.constant 0 : index
    %c0_0 = arith.constant 0 : index
    %0 = vector.load %arg1[%c0, %c0_0] : memref<128x128xbf16, #tpu.memory_space<vmem>>, vector<128x128xbf16>
    %c0_1 = arith.constant 0 : index
    %c0_2 = arith.constant 0 : index
    %1 = vector.load %arg2[%c0_1, %c0_2] : memref<128x256xbf16, #tpu.memory_space<vmem>>, vector<128x256xbf16>
    %cst = arith.constant dense<0.000000e+00> : vector<128x256xf32>
    %2 = tpu.matmul %0, %1, %cst {dimension_numbers = #tpu.dot_dimension_numbers<[1], [0], [0], [1], [0, 0, 1, 1], [], []>} : vector<128x128xbf16>, vector<128x256xbf16>, vector<128x256xf32> -> vector<128x256xf32>
    %c0_3 = arith.constant 0 : index
    %c0_4 = arith.constant 0 : index
    %3 = vector.load %arg3[%c0_3, %c0_4] : memref<1x256xf32, #tpu.memory_space<vmem>>, vector<1x256xf32>
    %4 = vector.broadcast %3 : vector<1x256xf32> to vector<128x256xf32>
    %5 = arith.addf %2, %4 : vector<128x256xf32>
    %6 = vector.extract_strided_slice %5 {offsets = [0, 128], sizes = [128, 128], strides = [1, 1]} : vector<128x256xf32> to vector<128x128xf32>
    %c0_5 = arith.constant 0 : index
    %c0_6 = arith.constant 0 : index
    %7 = vector.load %arg6[%c0_5, %c0_6] : memref<128x256xf32, #tpu.memory_space<vmem>>, vector<128x128xf32>
    tpu.vector_store %arg6[%c0_5, %c0_6], %6 {strides = array<i32>} : memref<128x256xf32, #tpu.memory_space<vmem>>, vector<128x128xf32>,
    %8 = vector.extract_strided_slice %5 {offsets = [0, 0], sizes = [128, 128], strides = [1, 1]} : vector<128x256xf32> to vector<128x128xf32>
    %cst_7 = arith.constant 0.000000e+00 : f32
    %9 = vector.broadcast %cst_7 : f32 to vector<128x128xf32>
    %10 = arith.maximumf %8, %9 : vector<128x128xf32>
    %11 = arith.truncf %10 : vector<128x128xf32> to vector<128x128xbf16>
    %c0_8 = arith.constant 0 : index
    %c0_9 = arith.constant 0 : index
    %12 = vector.load %arg4[%c0_8, %c0_9] : memref<128x128xbf16, #tpu.memory_space<vmem>>, vector<128x128xbf16>
    %cst_10 = arith.constant dense<0.000000e+00> : vector<128x128xf32>
    %13 = tpu.matmul %11, %12, %cst_10 {dimension_numbers = #tpu.dot_dimension_numbers<[1], [0], [0], [1], [0, 0, 1, 1], [], []>} : vector<128x128xbf16>, vector<128x128xbf16>, vector<128x128xf32> -> vector<128x128xf32>
    %c0_11 = arith.constant 0 : index
    %c0_12 = arith.constant 0 : index
    %14 = vector.load %arg5[%c0_11, %c0_12] : memref<1x128xf32, #tpu.memory_space<vmem>>, vector<1x128xf32>
    %15 = vector.broadcast %14 : vector<1x128xf32> to vector<128x128xf32>
    %16 = arith.addf %13, %15 : vector<128x128xf32>
    %c0_13 = arith.constant 0 : index
    %c128 = arith.constant 128 : index
    %17 = vector.load %arg6[%c0_13, %c128] : memref<128x256xf32, #tpu.memory_space<vmem>>, vector<128x128xf32>
    tpu.vector_store %arg6[%c0_13, %c128], %16 {strides = array<i32>} : memref<128x256xf32, #tpu.memory_space<vmem>>, vector<128x128xf32>,
    return
  }
  func.func @transform_0(%arg0: i32) -> (i32, i32) {
    %c0_i32 = arith.constant 0 : i32
    %c0_i32_0 = arith.constant 0 : i32
    return %arg0, %c0_i32 : i32, i32
  }
  func.func @transform_1(%arg0: i32) -> (i32, i32) {
    %c0_i32 = arith.constant 0 : i32
    %c0_i32_0 = arith.constant 0 : i32
    %c0_i32_1 = arith.constant 0 : i32
    return %c0_i32, %c0_i32_0 : i32, i32
  }
  func.func @transform_2(%arg0: i32) -> (i32, i32) {
    %c0_i32 = arith.constant 0 : i32
    %c0_i32_0 = arith.constant 0 : i32
    %c0_i32_1 = arith.constant 0 : i32
    return %c0_i32, %c0_i32_0 : i32, i32
  }
  func.func @transform_3(%arg0: i32) -> (i32, i32) {
    %c0_i32 = arith.constant 0 : i32
    %c0_i32_0 = arith.constant 0 : i32
    %c0_i32_1 = arith.constant 0 : i32
    return %c0_i32, %c0_i32_0 : i32, i32
  }
  func.func @transform_4(%arg0: i32) -> (i32, i32) {
    %c0_i32 = arith.constant 0 : i32
    %c0_i32_0 = arith.constant 0 : i32
    %c0_i32_1 = arith.constant 0 : i32
    return %c0_i32, %c0_i32_0 : i32, i32
  }
  func.func @transform_5(%arg0: i32) -> (i32, i32) {
    %c0_i32 = arith.constant 0 : i32
    %c0_i32_0 = arith.constant 0 : i32
    return %arg0, %c0_i32 : i32, i32
  }
}

</mosaic_0001>

<bundles_post_ra>
// kernel: user_fe_dnn_forward.1
= control target key start
LH: loop header
LB: loop body
LE: loop exit
PB: predicated region body
PF: predicated region fallthrough
CT: control target
= control target key end

     0   :  { %s980_s18 = smov 0   ;;  %s1167_s0 = inlined_call_operand.vmem [shape: bf16[256,128], index: 0, kind: input, shape index: {}]   ;;  %s1168_s1 = inlined_call_operand.vmem [shape: bf16[128,256], index: 1, kind: input, shape index: {}]   ;;  %s1169_s2 = inlined_call_operand.vmem [shape: f32[1,256], index: 2, kind: input, shape index: {}]   ;;  %s1170_s3 = inlined_call_operand.vmem [shape: bf16[128,128], index: 3, kind: input, shape index: {}]   ;;  %s1171_s4 = inlined_call_operand.vmem [shape: f32[1,128], index: 4, kind: input, shape index: {}]   ;;  %s1172_s5 = inlined_call_operand.vmem [shape: f32[256,256], index: 5, kind: output, shape index: {}]  }
   0x1 LB: > { %s798_s19 = sadd.s32 4294967295, %s947_s18   ;;  %p802_p0 = scmp.ge.s32.totalorder %s947_s18, 1  ;;  %s947_s18 = sphi %s980_s18, %s15_s18  }
   0x2   : > { %p188_p1 = scmp.lt.s32.totalorder %s947_s18, 3 }
   0x4   : > { %p189_p2 = pnand %p802_p0, %p188_p1 }
   0x5   : > { %v901_v0 = vld [vmem:[%s1168_s1 + $0x4] ss:$8 sps:$4 sm:$0xff] (!%p189_p2)   ;;  %s803_s22 = sshll.u32 (!%p189_p2), %s798_s19, 4  ;;  %v903_v1 = vld [vmem:[%s1168_s1] ss:$8 sps:$4 sm:$0xff] (!%p189_p2)   ;;  %v949_v2 = vmov (!%p189_p2), 0   ;;  %v265_v33 = vlaneseq (!%p189_p2) }
   0x6   : > { %192 = sbr.rel (%p189_p2) target bundleno = 532 (0x214), region = 40  ;;  %435 = vmatprep.mubr.bf16.mxu0 (!%p189_p2), %v949_v2  ;;  %p218_p3 = scmp.lt.s32.totalorder (!%p189_p2), %s803_s22, 31  ;;  %403 = vmatprep.subr.bf16.mxu0 (!%p189_p2), %v901_v0  ;;  %v904_v3 = vld [vmem:[%s1168_s1 + $0x14] ss:$8 sps:$4 sm:$0xff] (!%p189_p2)   ;;  %v906_v4 = vld [vmem:[%s1168_s1 + $0x10] ss:$8 sps:$4 sm:$0xff] (!%p189_p2)  }
   0x7   : > { %404 = vmatpush1.bf16.msra.mxu0 (!%p189_p2), %v903_v1  ;;  %v907_v5 = vld [vmem:[%s1168_s1 + $0x24] ss:$8 sps:$4 sm:$0xff] (!%p189_p2)   ;;  %v909_v6 = vld [vmem:[%s1168_s1 + $0x20] ss:$8 sps:$4 sm:$0xff] (!%p189_p2)   ;;  %v910_v7 = vld [vmem:[%s1168_s1 + $0x34] ss:$8 sps:$4 sm:$0xff] (!%p189_p2)  }
   0x8   : > { %405 = vmatprep.subr.bf16.mxu0 (!%p189_p2), %v904_v3  ;;  %v912_v8 = vld [vmem:[%s1168_s1 + $0x30] ss:$8 sps:$4 sm:$0xff] (!%p189_p2)   ;;  %v913_v9 = vld [vmem:[%s1168_s1 + $0x44] ss:$8 sps:$4 sm:$0xff] (!%p189_p2)   ;;  %v915_v10 = vld [vmem:[%s1168_s1 + $0x40] ss:$8 sps:$4 sm:$0xff] (!%p189_p2)  }
   0x9   : > { %v916_v11 = vld [vmem:[%s1168_s1 + $0x54] ss:$8 sps:$4 sm:$0xff] (!%p189_p2)   ;;  %v918_v12 = vld [vmem:[%s1168_s1 + $0x50] ss:$8 sps:$4 sm:$0xff] (!%p189_p2)   ;;  %v919_v13 = vld [vmem:[%s1168_s1 + $0x64] ss:$8 sps:$4 sm:$0xff] (!%p189_p2)  }
   0xa   : > { %v933_v14 = vld [vmem:[%s1170_s3] sm:$0xff] (!%p189_p2)   ;;  %v934_v15 = vld [vmem:[%s1170_s3 + $0x8] sm:$0xff] (!%p189_p2)   ;;  %v922_v17 = vld [vmem:[%s1168_s1 + $0x74] ss:$8 sps:$4 sm:$0xff] (!%p189_p2)   ;;  %v266_v34 = vshrl.u32 (!%p189_p2), %v265_v33, 7 }
   0xb   : > { %406 = vmatpush1.bf16.msra.mxu0 (!%p189_p2), %v906_v4  ;;  %v921_v16 = vld [vmem:[%s1168_s1 + $0x60] ss:$8 sps:$4 sm:$0xff] (!%p189_p2)   ;;  %860 = vmatprep.subr.bf16.mxu1 (!%p189_p2), %v933_v14  ;;  %v935_v18 = vld [vmem:[%s1170_s3 + $0x10] sm:$0xff] (!%p189_p2)   ;;  %v936_v20 = vld [vmem:[%s1170_s3 + $0x18] sm:$0xff] (!%p189_p2)  }
   0xc   : > { %407 = vmatprep.subr.bf16.mxu0 (!%p189_p2), %v907_v5  ;;  %861 = vmatpush3.bf16.msra.mxu1 (!%p189_p2), %v933_v14  ;;  %v924_v19 = vld [vmem:[%s1168_s1 + $0x70] ss:$8 sps:$4 sm:$0xff] (!%p189_p2)   ;;  %v937_v29 = vld [vmem:[%s1170_s3 + $0x20] sm:$0xff] (!%p189_p2)   ;;  %v938_v30 = vld [vmem:[%s1170_s3 + $0x28] sm:$0xff] (!%p189_p2)   ;;  %v267_v35 = vsub.s32 (!%p189_p2), 0, %v266_v34  ;;  %v271_v37 = vsub.s32 (!%p189_p2), 1, %v266_v34 }
   0xd   : > { %s1174_s22 = smov (!%p218_p3, %s803_s22), 31  ;;  %862 = vmatprep.subr.bf16.mxu1 %v934_v15  ;;  %v939_v31 = vld [vmem:[%s1170_s3 + $0x30] sm:$0xff]   ;;  %v940_v32 = vld [vmem:[%s1170_s3 + $0x38] sm:$0xff]   ;;  %v263_v36 = vld [vmem:[%s1169_s2] sm:$0x3] }
   0xe   : > { %s804_s6 = sshll.u32 %s1174_s22, 2  ;;  %v1087_v38 = vrot.slane %v263_v36, %v267_v35  ;;  %s843_s29 = sshll.u32 %s1174_s22, 4  ;;  %v1090_v39 = vrot.slane %v263_v36, %v271_v37 }
   0xf   : > { %s1016_s13 = scalar_lea.vmem %s1167_s0, %s804_s6  ;;  %408 = vmatpush1.bf16.msra.mxu0 %v909_v6  ;;  %s1095_s7 = scalar_lea.vmem %s1172_s5, %s843_s29 }
  0x10   : > { %409 = vmatprep.subr.bf16.mxu0 %v910_v7  ;;  %863 = vmatpush3.bf16.msra.mxu1 %v934_v15  ;;  %v925_v21 = vld [vmem:[%s1016_s13] sm:$0xff]   ;;  %v926_v22 = vld [vmem:[%s1016_s13 + $0x8] sm:$0xff]   ;;  %v927_v23 = vld [vmem:[%s1016_s13 + $0x10] sm:$0xff]  }
  0x11   : > { %864 = vmatprep.subr.bf16.mxu1 %v935_v18  ;;  %v928_v24 = vld [vmem:[%s1016_s13 + $0x18] sm:$0xff]   ;;  %v929_v25 = vld [vmem:[%s1016_s13 + $0x20] sm:$0xff]   ;;  %v930_v26 = vld [vmem:[%s1016_s13 + $0x28] sm:$0xff]  }
  0x12   : > { %v931_v27 = vld [vmem:[%s1016_s13 + $0x30] sm:$0xff]   ;;  %v932_v28 = vld [vmem:[%s1016_s13 + $0x38] sm:$0xff]  }
  0x13   : > { %410 = vmatpush1.bf16.msra.mxu0 %v912_v8 }
  0x14   : > { %411 = vmatprep.subr.bf16.mxu0 %v913_v9  ;;  %865 = vmatpush3.bf16.msra.mxu1 %v935_v18 }
  0x15   : > { %866 = vmatprep.subr.bf16.mxu1 %v936_v20 }
  0x17   : > { %412 = vmatpush1.bf16.msra.mxu0 %v915_v10 }
  0x18   : > { %413 = vmatprep.subr.bf16.mxu0 %v916_v11  ;;  %867 = vmatpush3.bf16.msra.mxu1 %v936_v20 }
  0x19   : > { %868 = vmatprep.subr.bf16.mxu1 %v937_v29 }
  0x1b   : > { %414 = vmatpush1.bf16.msra.mxu0 %v918_v12 }
  0x1c   : > { %415 = vmatprep.subr.bf16.mxu0 %v919_v13  ;;  %869 = vmatpush3.bf16.msra.mxu1 %v937_v29 }
  0x1d   : > { %870 = vmatprep.subr.bf16.mxu1 %v938_v30 }
  0x1f   : > { %416 = vmatpush1.bf16.msra.mxu0 %v921_v16 }
  0x20   : > { %417 = vmatprep.subr.bf16.mxu0 %v922_v17  ;;  %871 = vmatpush3.bf16.msra.mxu1 %v938_v30 }
  0x21   : > { %872 = vmatprep.subr.bf16.mxu1 %v939_v31 }
  0x23   : > { %418 = vmatpush1.bf16.msra.mxu0 %v924_v19 }
  0x24   : > { %873 = vmatpush3.bf16.msra.mxu1 %v939_v31 }
  0x25   : > { %874 = vmatprep.subr.bf16.mxu1 %v940_v32 }
  0x26   : > { %436 = vmatmul.mubr.bf16.vlgmr.msra.gmra.mrb[0].mxu0 %v925_v21 }
  0x27   : > { %445 = vmatprep.mubr.bf16.mxu0 %v949_v2 }
  0x28   : > { %875 = vmatpush3.bf16.msra.mxu1 %v940_v32 }
  0x2e   : > { %446 = vmatmul.mubr.bf16.gmra.mrb[4].mxu0 %v926_v22 }
  0x2f   : > { %455 = vmatprep.mubr.bf16.mxu0 %v949_v2 }
  0x36   : > { %456 = vmatmul.mubr.bf16.gmra.mrb[8].mxu0 %v927_v23 }
  0x37   : > { %465 = vmatprep.mubr.bf16.mxu0 %v949_v2 }
  0x3e   : > { %466 = vmatmul.mubr.bf16.gmra.mrb[12].mxu0 %v928_v24 }
  0x3f   : > { %475 = vmatprep.mubr.bf16.mxu0 %v949_v2 }
  0x46   : > { %476 = vmatmul.mubr.bf16.gmra.mrb[16].mxu0 %v929_v25 }
  0x47   : > { %485 = vmatprep.mubr.bf16.mxu0 %v949_v2 }
  0x4e   : > { %486 = vmatmul.mubr.bf16.gmra.mrb[20].mxu0 %v930_v26 }
  0x4f   : > { %495 = vmatprep.mubr.bf16.mxu0 %v949_v2 }
  0x56   : > { %496 = vmatmul.mubr.bf16.gmra.mrb[24].mxu0 %v931_v27 }
  0x57   : > { %505 = vmatprep.mubr.bf16.mxu0 %v949_v2 }
  0x5e   : > { %506 = vmatmul.mubr.bf16.gmra.mrb[28].mxu0 %v932_v28 }
  0xf9   : > { %v437_v40 = vpop.f32.mrb[0].mxu0 }
  0xfa   : > { %v438_v41 = vadd.f32 %v437_v40, %v1087_v38  ;;  %v439_v42 = vpop.f32.mrb[1].mxu0 }
  0xfb   : > { %v440_v43 = vadd.f32 %v439_v42, %v1090_v39  ;;  %v441_v44 = vpop.f32.mrb[2].mxu0 }
  0xfc   : > { %v442_v45 = vadd.f32 %v441_v44, %v1087_v38  ;;  %v443_v46 = vpop.f32.mrb[3].mxu0  ;;  %v532_v48 = vmax.f32 %v438_v41, 0.0 }
  0xfd   : > { %516 = vst [vmem:[%s1095_s7] sm:$0xff] %v440_v43  ;;  %v444_v47 = vadd.f32 %v443_v46, %v1090_v39 }
  0xfe   : > { %v533_v49 = vmax.f32 %v442_v45, 0.0 }
  0xff   : > { %517 = vst [vmem:[%s1095_s7 + $0x10] sm:$0xff] %v444_v47 }
 0x100   : > { %v548_v50 = vpack.c.bf16 %v533_v49, %v532_v48 }
 0x101   : > { %v447_v51 = vpop.f32.mrb[4].mxu0 }
 0x102   : > { %v448_v52 = vadd.f32 %v447_v51, %v1087_v38  ;;  %v449_v53 = vpop.f32.mrb[5].mxu0  ;;  %876 = vmatprep.mubr.bf16.mxu1 %v548_v50 }
 0x103   : > { %v450_v54 = vadd.f32 %v449_v53, %v1090_v39  ;;  %v451_v55 = vpop.f32.mrb[6].mxu0 }
 0x104   : > { %v452_v56 = vadd.f32 %v451_v55, %v1087_v38  ;;  %v453_v57 = vpop.f32.mrb[7].mxu0  ;;  %v534_v59 = vmax.f32 %v448_v52, 0.0 }
 0x105   : > { %518 = vst [vmem:[%s1095_s7 + $0x20] sm:$0xff] %v450_v54  ;;  %v454_v58 = vadd.f32 %v453_v57, %v1090_v39 }
 0x106   : > { %v535_v60 = vmax.f32 %v452_v56, 0.0 }
 0x107   : > { %519 = vst [vmem:[%s1095_s7 + $0x30] sm:$0xff] %v454_v58 }
 0x108   : > { %v549_v61 = vpack.c.bf16 %v535_v60, %v534_v59 }
 0x109   : > { %v457_v62 = vpop.f32.mrb[8].mxu0 }
 0x10a   : > { %v458_v63 = vadd.f32 %v457_v62, %v1087_v38  ;;  %v459_v0 = vpop.f32.mrb[9].mxu0  ;;  %877 = vmatmul.mubr.bf16.vlgmr.msra.gmra.mrb[0].mxu1 %v549_v61 }
 0x10b   : > { %v460_v1 = vadd.f32 %v459_v0, %v1090_v39  ;;  %v461_v2 = vpop.f32.mrb[10].mxu0 }
 0x10c   : > { %v462_v3 = vadd.f32 %v461_v2, %v1087_v38  ;;  %v463_v4 = vpop.f32.mrb[11].mxu0  ;;  %v536_v6 = vmax.f32 %v458_v63, 0.0  ;;  %v832_v2 = vld [vmem:[%s1171_s4] ss:$0 sm:$0xff] }
 0x10d   : > { %520 = vst [vmem:[%s1095_s7 + $0x40] sm:$0xff] %v460_v1  ;;  %v464_v5 = vadd.f32 %v463_v4, %v1090_v39 }
 0x10e   : > { %v537_v7 = vmax.f32 %v462_v3, 0.0 }
 0x10f   : > { %521 = vst [vmem:[%s1095_s7 + $0x50] sm:$0xff] %v464_v5 }
 0x110   : > { %v550_v8 = vpack.c.bf16 %v537_v7, %v536_v6 }
 0x111   : > { %v467_v9 = vpop.f32.mrb[12].mxu0 }
 0x112   : > { %v468_v10 = vadd.f32 %v467_v9, %v1087_v38  ;;  %v469_v11 = vpop.f32.mrb[13].mxu0  ;;  %880 = vmatprep.mubr.bf16.mxu1 %v550_v8 }
 0x113   : > { %v470_v12 = vadd.f32 %v469_v11, %v1090_v39  ;;  %v471_v13 = vpop.f32.mrb[14].mxu0 }
 0x114   : > { %v472_v14 = vadd.f32 %v471_v13, %v1087_v38  ;;  %v473_v15 = vpop.f32.mrb[15].mxu0  ;;  %v538_v17 = vmax.f32 %v468_v10, 0.0 }
 0x115   : > { %522 = vst [vmem:[%s1095_s7 + $0x60] sm:$0xff] %v470_v12  ;;  %v474_v16 = vadd.f32 %v473_v15, %v1090_v39 }
 0x116   : > { %v539_v18 = vmax.f32 %v472_v14, 0.0 }
 0x117   : > { %523 = vst [vmem:[%s1095_s7 + $0x70] sm:$0xff] %v474_v16 }
 0x118   : > { %v551_v19 = vpack.c.bf16 %v539_v18, %v538_v17 }
 0x119   : > { %v477_v20 = vpop.f32.mrb[16].mxu0 }
 0x11a   : > { %v478_v21 = vadd.f32 %v477_v20, %v1087_v38  ;;  %v479_v22 = vpop.f32.mrb[17].mxu0  ;;  %881 = vmatmul.mubr.bf16.gmra.mrb[4].mxu1 %v551_v19 }
 0x11b   : > { %v480_v23 = vadd.f32 %v479_v22, %v1090_v39  ;;  %v481_v24 = vpop.f32.mrb[18].mxu0 }
 0x11c   : > { %v482_v25 = vadd.f32 %v481_v24, %v1087_v38  ;;  %v483_v26 = vpop.f32.mrb[19].mxu0  ;;  %v540_v28 = vmax.f32 %v478_v21, 0.0 }
 0x11d   : > { %524 = vst [vmem:[%s1095_s7 + $0x80] sm:$0xff] %v480_v23  ;;  %v484_v27 = vadd.f32 %v483_v26, %v1090_v39 }
 0x11e   : > { %v541_v29 = vmax.f32 %v482_v25, 0.0 }
 0x11f   : > { %525 = vst [vmem:[%s1095_s7 + $0x90] sm:$0xff] %v484_v27 }
 0x120   : > { %v552_v30 = vpack.c.bf16 %v541_v29, %v540_v28 }
 0x121   : > { %v487_v31 = vpop.f32.mrb[20].mxu0 }
 0x122   : > { %v488_v32 = vadd.f32 %v487_v31, %v1087_v38  ;;  %v489_v33 = vpop.f32.mrb[21].mxu0  ;;  %884 = vmatprep.mubr.bf16.mxu1 %v552_v30 }
 0x123   : > { %v490_v34 = vadd.f32 %v489_v33, %v1090_v39  ;;  %v491_v35 = vpop.f32.mrb[22].mxu0 }
 0x124   : > { %v492_v36 = vadd.f32 %v491_v35, %v1087_v38  ;;  %v493_v37 = vpop.f32.mrb[23].mxu0  ;;  %v542_v41 = vmax.f32 %v488_v32, 0.0 }
 0x125   : > { %526 = vst [vmem:[%s1095_s7 + $0xa0] sm:$0xff] %v490_v34  ;;  %v494_v40 = vadd.f32 %v493_v37, %v1090_v39 }
 0x126   : > { %v543_v42 = vmax.f32 %v492_v36, 0.0 }
 0x127   : > { %527 = vst [vmem:[%s1095_s7 + $0xb0] sm:$0xff] %v494_v40 }
 0x128   : > { %v553_v43 = vpack.c.bf16 %v543_v42, %v542_v41 }
 0x129   : > { %v497_v44 = vpop.f32.mrb[24].mxu0 }
 0x12a   : > { %v498_v45 = vadd.f32 %v497_v44, %v1087_v38  ;;  %v499_v46 = vpop.f32.mrb[25].mxu0  ;;  %885 = vmatmul.mubr.bf16.gmra.mrb[8].mxu1 %v553_v43 }
 0x12b   : > { %v500_v47 = vadd.f32 %v499_v46, %v1090_v39  ;;  %v501_v48 = vpop.f32.mrb[26].mxu0 }
 0x12c   : > { %v502_v49 = vadd.f32 %v501_v48, %v1087_v38  ;;  %v503_v50 = vpop.f32.mrb[27].mxu0  ;;  %v544_v52 = vmax.f32 %v498_v45, 0.0 }
 0x12d   : > { %528 = vst [vmem:[%s1095_s7 + $0xc0] sm:$0xff] %v500_v47  ;;  %v504_v51 = vadd.f32 %v503_v50, %v1090_v39 }
 0x12e   : > { %v545_v53 = vmax.f32 %v502_v49, 0.0 }
 0x12f   : > { %529 = vst [vmem:[%s1095_s7 + $0xd0] sm:$0xff] %v504_v51 }
 0x130   : > { %v554_v54 = vpack.c.bf16 %v545_v53, %v544_v52 }
 0x131   : > { %v507_v55 = vpop.f32.mrb[28].mxu0 }
 0x132   : > { %v508_v56 = vadd.f32 %v507_v55, %v1087_v38  ;;  %v509_v57 = vpop.f32.mrb[29].mxu0  ;;  %888 = vmatprep.mubr.bf16.mxu1 %v554_v54 }
 0x133   : > { %v510_v58 = vadd.f32 %v509_v57, %v1090_v39  ;;  %v511_v59 = vpop.f32.mrb[30].mxu0 }
 0x134   : > { %v512_v60 = vadd.f32 %v511_v59, %v1087_v38  ;;  %v513_v61 = vpop.f32.mrb[31].mxu0  ;;  %v546_v63 = vmax.f32 %v508_v56, 0.0 }
 0x135   : > { %530 = vst [vmem:[%s1095_s7 + $0xe0] sm:$0xff] %v510_v58  ;;  %v514_v62 = vadd.f32 %v513_v61, %v1090_v39 }
 0x136   : > { %v547_v0 = vmax.f32 %v512_v60, 0.0 }
 0x137   : > { %531 = vst [vmem:[%s1095_s7 + $0xf0] sm:$0xff] %v514_v62 }
 0x138   : > { %v555_v1 = vpack.c.bf16 %v547_v0, %v546_v63 }
 0x13a   : > { %889 = vmatmul.mubr.bf16.gmra.mrb[12].mxu1 %v555_v1 }
 0x1dd   : > { %v878_v3 = vpop.f32.mrb[0].mxu1 }
 0x1de   : > { %v670_v4 = vadd.f32 %v878_v3, %v832_v2  ;;  %v661_v38 = vpop.f32.mrb[1].mxu1 }
 0x1df   : > { %v662_v5 = vadd.f32 %v832_v2, %v661_v38  ;;  %v879_v6 = vpop.f32.mrb[2].mxu1 }
 0x1e0   : > { %726 = vst [vmem:[%s1095_s7 + $0x28] sm:$0xff] %v670_v4  ;;  %v673_v39 = vadd.f32 %v879_v6, %v832_v2  ;;  %v664_v7 = vpop.f32.mrb[3].mxu1 }
 0x1e1   : > { %724 = vst [vmem:[%s1095_s7 + $0x8] sm:$0xff] %v662_v5  ;;  %v665_v8 = vadd.f32 %v832_v2, %v664_v7 }
 0x1e2   : > { %727 = vst [vmem:[%s1095_s7 + $0x38] sm:$0xff] %v673_v39 }
 0x1e3   : > { %725 = vst [vmem:[%s1095_s7 + $0x18] sm:$0xff] %v665_v8 }
 0x1ed   : > { %v882_v9 = vpop.f32.mrb[4].mxu1 }
 0x1ee   : > { %v686_v10 = vadd.f32 %v882_v9, %v832_v2  ;;  %v677_v11 = vpop.f32.mrb[5].mxu1 }
 0x1ef   : > { %v678_v12 = vadd.f32 %v832_v2, %v677_v11  ;;  %v883_v13 = vpop.f32.mrb[6].mxu1 }
 0x1f0   : > { %730 = vst [vmem:[%s1095_s7 + $0x68] sm:$0xff] %v686_v10  ;;  %v689_v14 = vadd.f32 %v883_v13, %v832_v2  ;;  %v680_v15 = vpop.f32.mrb[7].mxu1 }
 0x1f1   : > { %728 = vst [vmem:[%s1095_s7 + $0x48] sm:$0xff] %v678_v12  ;;  %v681_v16 = vadd.f32 %v832_v2, %v680_v15 }
 0x1f2   : > { %731 = vst [vmem:[%s1095_s7 + $0x78] sm:$0xff] %v689_v14 }
 0x1f3   : > { %729 = vst [vmem:[%s1095_s7 + $0x58] sm:$0xff] %v681_v16 }
 0x1fd   : > { %v886_v17 = vpop.f32.mrb[8].mxu1 }
 0x1fe   : > { %v702_v18 = vadd.f32 %v886_v17, %v832_v2  ;;  %v693_v19 = vpop.f32.mrb[9].mxu1 }
 0x1ff   : > { %v694_v20 = vadd.f32 %v832_v2, %v693_v19  ;;  %v887_v21 = vpop.f32.mrb[10].mxu1 }
 0x200   : > { %734 = vst [vmem:[%s1095_s7 + $0xa8] sm:$0xff] %v702_v18  ;;  %v705_v22 = vadd.f32 %v887_v21, %v832_v2  ;;  %v696_v23 = vpop.f32.mrb[11].mxu1 }
 0x201   : > { %732 = vst [vmem:[%s1095_s7 + $0x88] sm:$0xff] %v694_v20  ;;  %v697_v24 = vadd.f32 %v832_v2, %v696_v23 }
 0x202   : > { %735 = vst [vmem:[%s1095_s7 + $0xb8] sm:$0xff] %v705_v22 }
 0x203   : > { %733 = vst [vmem:[%s1095_s7 + $0x98] sm:$0xff] %v697_v24 }
 0x20d   : > { %v890_v25 = vpop.f32.mrb[12].mxu1 }
 0x20e   : > { %v718_v26 = vadd.f32 %v890_v25, %v832_v2  ;;  %v709_v27 = vpop.f32.mrb[13].mxu1 }
 0x20f   : > { %v710_v28 = vadd.f32 %v832_v2, %v709_v27  ;;  %v891_v29 = vpop.f32.mrb[14].mxu1 }
 0x210   : > { %738 = vst [vmem:[%s1095_s7 + $0xe8] sm:$0xff] %v718_v26  ;;  %v721_v30 = vadd.f32 %v891_v29, %v832_v2  ;;  %v712_v31 = vpop.f32.mrb[15].mxu1 }
 0x211   : > { %736 = vst [vmem:[%s1095_s7 + $0xc8] sm:$0xff] %v710_v28  ;;  %v713_v32 = vadd.f32 %v832_v2, %v712_v31 }
 0x212   : > { %739 = vst [vmem:[%s1095_s7 + $0xf8] sm:$0xff] %v721_v30 }
 0x213   : > { %737 = vst [vmem:[%s1095_s7 + $0xd8] sm:$0xff] %v713_v32 }
 0x214 PF: > { %s15_s18 = sadd.s32 1, %s947_s18  }
 0x215   : > { %p12_p4 = scmp.ge.s32.totalorder %s15_s18, 4  }
 0x217   :  { %14 = sbr.rel (!%p12_p4) target bundleno = 1 (0x1), region = 70 }

</bundles_post_ra>
